<compile_context>
chip_gen: v7x
topology: tpu7x:2x2x1
jax: 0.10.0
libtpu: 0.0.40
codegen_flags: <defaults>
</compile_context>

<pallas_src>
import functools

import jax
import jax.numpy as jnp
from jax.experimental import pallas as pl
from jax.experimental.pallas import tpu as pltpu


def _round_up(x: int, m: int) -> int:
    return (x + m - 1) // m * m


def _nt_xent_kernel(zr_ref, zc_ref, partial_ref, denom_ref, *,
                    inv_temp: float, batch: int):
    """One (row-block, col-block) step of the streamed NT-Xent loss.

    zr_ref / zc_ref : (2t, Dp) row / column blocks of the block-interleaved,
                      pre-normalized, pre-scaled embeddings
                      (rows [0:t] are z_i rows, rows [t:2t] their z_j partners).
    partial_ref     : SMEM (1, 1) per-row-block partial loss (written at last col).
    denom_ref       : VMEM (2t, 128) lane-dense running softmax denominator.
    """
    r = pl.program_id(0)
    c = pl.program_id(1)
    last_c = pl.num_programs(1) - 1

    bt = zr_ref.shape[0]          # 2 * t  (stacked z_i | z_j rows)
    half = bt // 2
    inv_t = jnp.float32(inv_temp)

    @pl.when(c == 0)
    def _():
        denom_ref[...] = jnp.zeros_like(denom_ref)

    zr = zr_ref[...]
    zc = zc_ref[...]

    # Single fused MXU call per step: NT contraction (contract feature dims of
    # both operands -> no transpose), f32 accumulation.
    dn = (((1,), (1,)), ((), ()))
    sim = jax.lax.dot_general(zr, zc, dn, preferred_element_type=jnp.float32)

    # Constant-max online logsumexp: rows were L2-normalized and scaled by
    # sqrt(1/temperature) in the wrapper, so every sim entry <= 1/temperature
    # (up to bf16 rounding) and exp(sim - 1/temperature) <= ~1.
    e = jnp.exp(sim - inv_t)

    def fold_lanes(x):
        # (bt, bt) -> (bt, 128): pure VPU adds over static lane-aligned
        # 128-wide slices; no per-step cross-lane XLU reduction, dense stores.
        acc = x[:, 0:128]
        for g in range(1, bt // 128):
            acc = acc + x[:, g * 128:(g + 1) * 128]
        return acc

    # Masks are only needed on diagonal blocks (self-similarity) and on the
    # last column block (batch padding); everything else takes the cheap path.
    needs_mask = jnp.logical_or(r == c, c == last_c)

    @pl.when(needs_mask)
    def _():
        li = jax.lax.broadcasted_iota(jnp.int32, (bt, 1), 0)
        lj = jax.lax.broadcasted_iota(jnp.int32, (1, bt), 1)
        not_self = jnp.logical_or(r != c, li != lj)            # diagonal iff r == c
        col_orig = c * half + jnp.where(lj < half, lj, lj - half)
        valid = jnp.logical_and(not_self, col_orig < batch)    # pad cols iff last c
        denom_ref[...] += fold_lanes(jnp.where(valid, e, 0.0))

    @pl.when(jnp.logical_not(needs_mask))
    def _():
        denom_ref[...] += fold_lanes(e)

    @pl.when(c == last_c)
    def _():
        # Single cross-lane reduction per row block.
        denom = jnp.sum(denom_ref[...], axis=-1, keepdims=True)       # (bt, 1)
        # Guard against f32 underflow of the constant-max LSE (all exp terms
        # flushing to zero) at extreme temperatures.
        # TODO(synk): switch to a running-max online softmax if temperatures
        # below ~0.02 must be supported exactly.
        lse = inv_t + jnp.log(jnp.maximum(denom, jnp.float32(1e-37)))

        row_i = jax.lax.broadcasted_iota(jnp.int32, (bt, 1), 0)
        row_orig = r * half + jnp.where(row_i < half, row_i, row_i - half)
        lse_sum = jnp.sum(jnp.where(row_orig < batch, lse, 0.0))

        # Positive logit <zn_i[a], zn_j[a]> (already scaled by 1/temperature);
        # identical for a pair's z_i row and z_j row -> counted twice.  Using
        # the same (possibly bf16) data as the matmul keeps it consistent with
        # the partner term inside the denominator.
        zi = zr[:half].astype(jnp.float32)
        zj = zr[half:].astype(jnp.float32)
        pos = jnp.sum(zi * zj, axis=-1, keepdims=True)                 # (half, 1)
        pos_i = jax.lax.broadcasted_iota(jnp.int32, (half, 1), 0)
        pos_sum = jnp.sum(jnp.where(r * half + pos_i < batch, pos, 0.0))

        partial_ref[0, 0] = lse_sum - 2.0 * pos_sum


def _prep_embeddings(z, temperature, matmul_dtype):
    """flatten -> f32 L2-normalize (eps clamp) -> fold sqrt(1/temp) -> cast."""
    B = z.shape[0]
    z = z.reshape(B, -1).astype(jnp.float32)
    ssq = jnp.sum(z * z, axis=-1, keepdims=True)
    # torch CosineSimilarity eps=1e-8 clamps the norm -> clamp sum-of-squares.
    scale = jax.lax.rsqrt(jnp.maximum(ssq, jnp.float32(1e-16)))
    scale = scale * jnp.float32((1.0 / float(temperature)) ** 0.5)
    return (z * scale).astype(matmul_dtype)


def _select_tile(B, Dp, itemsize, block):
    """Largest lane-aligned half-batch tile whose working set fits the budget."""
    t = min(int(block), _round_up(B, 128))
    t = max(128, _round_up(t, 128))

    def need(tt):
        bt = 2 * tt
        inputs = 2 * 2 * bt * Dp * itemsize     # row + col specs, double-buffered
        scratch = bt * 128 * 4                  # lane-dense denominator
        interm = 5 * bt * bt * 4                # sim / exp / masked / bool tiles
        return inputs + scratch + interm

    budget = 40 * 1024 * 1024                   # conservative: v7x VMEM is 64 MiB
    while t > 128 and need(t) > budget:
        t -= 128
    return t, need(t)


def nt_xent_loss(z_i, z_j, temperature: float, *, block: int = 512,
                 matmul_dtype=jnp.bfloat16):
    """z_i, z_j: (B, ...) arrays (e.g. NCHW feature maps). Returns scalar f32 loss.

    matmul_dtype: bf16 (default) = native MXU path; f32 = parity/testing switch
                  (the LSE / log / exp math is always f32 either way).
    """
    B = z_i.shape[0]
    D = 1
    for s in z_i.shape[1:]:
        D *= s
    N = 2 * B

    Dp = _round_up(D, 128)
    itemsize = jnp.dtype(matmul_dtype).itemsize
    t, vmem_need = _select_tile(B, Dp, itemsize, block)
    Bp = _round_up(B, t)
    nblk = Bp // t
    bt = 2 * t

    zn_i = _prep_embeddings(z_i, temperature, matmul_dtype)
    zn_j = _prep_embeddings(z_j, temperature, matmul_dtype)
    pad = ((0, Bp - B), (0, Dp - D))
    zn_i = jnp.pad(zn_i, pad)      # padded rows are zero; masked in the kernel
    zn_j = jnp.pad(zn_j, pad)

    # Block-interleave so each (2t, Dp) row/column block is [z_i tile ; z_j tile]:
    # one fused MXU contraction per grid step covers all four ii/ij/ji/jj sims.
    zcat = jnp.stack(
        [zn_i.reshape(nblk, t, Dp), zn_j.reshape(nblk, t, Dp)], axis=1
    ).reshape(nblk * bt, Dp)

    kernel = functools.partial(_nt_xent_kernel,
                               inv_temp=1.0 / float(temperature), batch=B)

    row_spec = pl.BlockSpec((bt, Dp), lambda r, c: (r, 0))   # resident across c
    col_spec = pl.BlockSpec((bt, Dp), lambda r, c: (c, 0))   # streamed

    cost = pl.CostEstimate(
        flops=2 * (2 * Bp) * (2 * Bp) * Dp,
        transcendentals=(2 * Bp) * (2 * Bp),
        bytes_accessed=(nblk + 1) * (2 * Bp) * Dp * itemsize + nblk * 4,
    )

    partials = pl.pallas_call(
        kernel,
        out_shape=jax.ShapeDtypeStruct((nblk, 1), jnp.float32),
        grid_spec=pltpu.PrefetchScalarGridSpec(
            num_scalar_prefetch=0,
            grid=(nblk, nblk),
            in_specs=[row_spec, col_spec],
            out_specs=pl.BlockSpec((1, 1), lambda r, c: (r, 0),
                                   memory_space=pltpu.SMEM),
            scratch_shapes=[pltpu.VMEM((bt, 128), jnp.float32)],
        ),
        compiler_params=pltpu.CompilerParams(
            dimension_semantics=("parallel", "arbitrary"),
            vmem_limit_bytes=48 * 1024 * 1024),
        cost_estimate=cost,
    )(zcat, zcat)

    return jnp.sum(partials) / jnp.float32(N)


def _nt_xent_ref(z_i, z_j, temperature: float):
    """Pure-JAX reference mirroring the PyTorch module."""
    B = z_i.shape[0]
    z_i = z_i.reshape(B, -1).astype(jnp.float32)
    z_j = z_j.reshape(B, -1).astype(jnp.float32)
    z = jnp.concatenate([z_i, z_j], axis=0)
    N = 2 * B
    zn = z / jnp.maximum(jnp.linalg.norm(z, axis=-1, keepdims=True), 1e-8)
    sim = jnp.matmul(zn, zn.T, precision=jax.lax.Precision.HIGHEST) / temperature
    idx = jnp.arange(N)
    pos = sim[idx, (idx + B) % N]
    masked = jnp.where(jnp.eye(N, dtype=bool), -jnp.inf, sim)
    lse = jax.scipy.special.logsumexp(masked, axis=-1)
    return jnp.sum(lse - pos) / N


if __name__ == "__main__":
    key = jax.random.PRNGKey(0)
    k1, k2, k3, k4 = jax.random.split(key, 4)
    temperature = 0.5

    # Small NCHW feature maps consistent with the module: batch=4, C=4, H=2, W=4.
    z_i = jax.random.normal(k1, (4, 4, 2, 4), dtype=jnp.float32)
    z_j = jax.random.normal(k2, (4, 4, 2, 4), dtype=jnp.float32)
    ref = _nt_xent_ref(z_i, z_j, temperature)

    loss_f32 = nt_xent_loss(z_i, z_j, temperature, matmul_dtype=jnp.float32)
    jax.block_until_ready(loss_f32)
    assert jnp.allclose(loss_f32, ref, rtol=1e-3, atol=1e-3), (loss_f32, ref)

    loss_bf16 = nt_xent_loss(z_i, z_j, temperature)            # default fast path
    jax.block_until_ready(loss_bf16)
    assert jnp.allclose(loss_bf16, ref, rtol=5e-2, atol=5e-2), (loss_bf16, ref)

    # Multi-block path: exercises the 2x2 grid, r==c vs r!=c mask gating, the
    # last-column batch-padding mask and multi-step denominator accumulation.
    z_i2 = jax.random.normal(k3, (160, 96), dtype=jnp.float32)
    z_j2 = jax.random.normal(k4, (160, 96), dtype=jnp.float32)
    ref2 = _nt_xent_ref(z_i2, z_j2, temperature)

    loss2_f32 = nt_xent_loss(z_i2, z_j2, temperature, block=128,
                             matmul_dtype=jnp.float32)
    jax.block_until_ready(loss2_f32)
    assert jnp.allclose(loss2_f32, ref2, rtol=1e-3, atol=1e-3), (loss2_f32, ref2)

    loss2_bf16 = nt_xent_loss(z_i2, z_j2, temperature, block=128)
    jax.block_until_ready(loss2_bf16)
    assert jnp.allclose(loss2_bf16, ref2, rtol=5e-2, atol=5e-2), (loss2_bf16, ref2)

    print("KERNEL_OK")
</pallas_src>

<mosaic_0001>
module attributes {stable_mosaic.version = 11 : i64} {
  func.func @_nt_xent_kernel(%arg0: i32, %arg1: i32, %arg2: memref<256x128xf32, #tpu.memory_space<vmem>>, %arg3: memref<256x128xf32, #tpu.memory_space<vmem>>, %arg4: memref<1x1xf32, #tpu.memory_space<smem>>, %arg5: memref<256x128xf32, #tpu.memory_space<vmem>>) attributes {dimension_semantics = [#tpu.dimension_semantics<parallel>, #tpu.dimension_semantics<arbitrary>], iteration_bounds = array<i64: 1, 1>, scalar_prefetch = 0 : i64, scratch_operands = 1 : i64, tpu.core_type = #tpu.core_type<tc>, window_params = [{transform_indices = @transform_0, window_bounds = array<i64: 256, 128>}, {transform_indices = @transform_1, window_bounds = array<i64: 256, 128>}, {transform_indices = @transform_2, window_bounds = array<i64: 1, 1>}]} {
    %c0_i32 = arith.constant 0 : i32
    %0 = arith.cmpi eq, %arg1, %c0_i32 : i32
    %1 = arith.extui %0 : i1 to i32
    %c0_i32_0 = arith.constant 0 : i32
    %2 = arith.cmpi ne, %1, %c0_i32_0 : i32
    scf.if %2 {
      %cst_11 = arith.constant 0.000000e+00 : f32
      %20 = vector.broadcast %cst_11 : f32 to vector<256x128xf32>
      %c0_12 = arith.constant 0 : index
      %c0_13 = arith.constant 0 : index
      %21 = vector.load %arg5[%c0_12, %c0_13] : memref<256x128xf32, #tpu.memory_space<vmem>>, vector<256x128xf32>
      tpu.vector_store %arg5[%c0_12, %c0_13], %20 {strides = array<i32>} : memref<256x128xf32, #tpu.memory_space<vmem>>, vector<256x128xf32>,
    } else {
    }
    %c0 = arith.constant 0 : index
    %c0_1 = arith.constant 0 : index
    %3 = vector.load %arg2[%c0, %c0_1] : memref<256x128xf32, #tpu.memory_space<vmem>>, vector<256x128xf32>
    %c0_2 = arith.constant 0 : index
    %c0_3 = arith.constant 0 : index
    %4 = vector.load %arg3[%c0_2, %c0_3] : memref<256x128xf32, #tpu.memory_space<vmem>>, vector<256x128xf32>
    %cst = arith.constant dense<0.000000e+00> : vector<256x256xf32>
    %5 = tpu.matmul %3, %4, %cst {dimension_numbers = #tpu.dot_dimension_numbers<[1], [1], [0], [0], [0, 0, 1, 0], [], []>} : vector<256x128xf32>, vector<256x128xf32>, vector<256x256xf32> -> vector<256x256xf32>
    %cst_4 = arith.constant 2.000000e+00 : f32
    %6 = vector.broadcast %cst_4 : f32 to vector<256x256xf32>
    %7 = arith.subf %5, %6 : vector<256x256xf32>
    %8 = math.exp %7 : vector<256x256xf32>
    %9 = arith.cmpi eq, %arg0, %arg1 : i32
    %c0_i32_5 = arith.constant 0 : i32
    %10 = arith.cmpi eq, %arg1, %c0_i32_5 : i32
    %11 = arith.ori %9, %10 : i1
    %12 = arith.extui %11 : i1 to i32
    %c0_i32_6 = arith.constant 0 : i32
    %13 = arith.cmpi ne, %12, %c0_i32_6 : i32
    scf.if %13 {
      %20 = tpu.iota {dimensions = array<i32: 0>} : vector<256x1xi32>
      %21 = tpu.iota {dimensions = array<i32: 1>} : vector<1x256xi32>
      %22 = arith.cmpi ne, %arg0, %arg1 : i32
      %23 = vector.broadcast %20 : vector<256x1xi32> to vector<256x256xi32>
      %24 = vector.broadcast %21 : vector<1x256xi32> to vector<256x256xi32>
      %25 = arith.cmpi ne, %23, %24 : vector<256x256xi32>
      %26 = vector.broadcast %22 : i1 to vector<256x256xi1>
      %27 = arith.ori %26, %25 : vector<256x256xi1>
      %c128_i32 = arith.constant 128 : i32
      %28 = arith.muli %arg1, %c128_i32 : i32
      %c128_i32_11 = arith.constant 128 : i32
      %29 = vector.broadcast %c128_i32_11 : i32 to vector<1x256xi32>
      %30 = arith.cmpi slt, %21, %29 : vector<1x256xi32>
      %c128_i32_12 = arith.constant 128 : i32
      %31 = vector.broadcast %c128_i32_12 : i32 to vector<1x256xi32>
      %32 = arith.subi %21, %31 : vector<1x256xi32>
      %33 = arith.select %30, %21, %32 : vector<1x256xi1>, vector<1x256xi32>
      %34 = vector.broadcast %28 : i32 to vector<1x256xi32>
      %35 = arith.addi %34, %33 : vector<1x256xi32>
      %c4_i32 = arith.constant 4 : i32
      %36 = vector.broadcast %c4_i32 : i32 to vector<1x256xi32>
      %37 = arith.cmpi slt, %35, %36 : vector<1x256xi32>
      %38 = vector.broadcast %37 : vector<1x256xi1> to vector<256x256xi1>
      %39 = arith.andi %27, %38 : vector<256x256xi1>
      %c0_13 = arith.constant 0 : index
      %c0_14 = arith.constant 0 : index
      %40 = vector.load %arg5[%c0_13, %c0_14] : memref<256x128xf32, #tpu.memory_space<vmem>>, vector<256x128xf32>
      %cst_15 = arith.constant 0.000000e+00 : f32
      %41 = vector.broadcast %cst_15 : f32 to vector<256x256xf32>
      %42 = arith.select %39, %8, %41 : vector<256x256xi1>, vector<256x256xf32>
      %43 = vector.extract_strided_slice %42 {offsets = [0, 0], sizes = [256, 128], strides = [1, 1]} : vector<256x256xf32> to vector<256x128xf32>
      %44 = vector.extract_strided_slice %42 {offsets = [0, 128], sizes = [256, 128], strides = [1, 1]} : vector<256x256xf32> to vector<256x128xf32>
      %45 = arith.addf %43, %44 : vector<256x128xf32>
      %46 = arith.addf %40, %45 : vector<256x128xf32>
      %c0_16 = arith.constant 0 : index
      %c0_17 = arith.constant 0 : index
      %47 = vector.load %arg5[%c0_16, %c0_17] : memref<256x128xf32, #tpu.memory_space<vmem>>, vector<256x128xf32>
      tpu.vector_store %arg5[%c0_16, %c0_17], %46 {strides = array<i32>} : memref<256x128xf32, #tpu.memory_space<vmem>>, vector<256x128xf32>,
    } else {
    }
    %true = arith.constant true
    %14 = arith.xori %11, %true : i1
    %15 = arith.extui %14 : i1 to i32
    %c0_i32_7 = arith.constant 0 : i32
    %16 = arith.cmpi ne, %15, %c0_i32_7 : i32
    scf.if %16 {
      %c0_11 = arith.constant 0 : index
      %c0_12 = arith.constant 0 : index
      %20 = vector.load %arg5[%c0_11, %c0_12] : memref<256x128xf32, #tpu.memory_space<vmem>>, vector<256x128xf32>
      %21 = vector.extract_strided_slice %8 {offsets = [0, 0], sizes = [256, 128], strides = [1, 1]} : vector<256x256xf32> to vector<256x128xf32>
      %22 = vector.extract_strided_slice %8 {offsets = [0, 128], sizes = [256, 128], strides = [1, 1]} : vector<256x256xf32> to vector<256x128xf32>
      %23 = arith.addf %21, %22 : vector<256x128xf32>
      %24 = arith.addf %20, %23 : vector<256x128xf32>
      %c0_13 = arith.constant 0 : index
      %c0_14 = arith.constant 0 : index
      %25 = vector.load %arg5[%c0_13, %c0_14] : memref<256x128xf32, #tpu.memory_space<vmem>>, vector<256x128xf32>
      tpu.vector_store %arg5[%c0_13, %c0_14], %24 {strides = array<i32>} : memref<256x128xf32, #tpu.memory_space<vmem>>, vector<256x128xf32>,
    } else {
    }
    %c0_i32_8 = arith.constant 0 : i32
    %17 = arith.cmpi eq, %arg1, %c0_i32_8 : i32
    %18 = arith.extui %17 : i1 to i32
    %cst_9 = arith.constant 2.000000e+00 : f32
    %c0_i32_10 = arith.constant 0 : i32
    %19 = arith.cmpi ne, %18, %c0_i32_10 : i32
    scf.if %19 {
      %c0_11 = arith.constant 0 : index
      %c0_12 = arith.constant 0 : index
      %20 = vector.load %arg5[%c0_11, %c0_12] : memref<256x128xf32, #tpu.memory_space<vmem>>, vector<256x128xf32>
      %cst_13 = arith.constant dense<0.000000e+00> : vector<256xf32>
      %21 = vector.multi_reduction <add>, %20, %cst_13 [1] : vector<256x128xf32> to vector<256xf32>
      %22 = vector.shape_cast %21 : vector<256xf32> to vector<256x1xf32>
      %cst_14 = arith.constant 9.99999991E-38 : f32
      %23 = vector.broadcast %cst_14 : f32 to vector<256x1xf32>
      %24 = arith.maximumf %22, %23 : vector<256x1xf32>
      %25 = math.log %24 : vector<256x1xf32>
      %26 = vector.broadcast %cst_9 : f32 to vector<256x1xf32>
      %27 = arith.addf %26, %25 : vector<256x1xf32>
      %28 = tpu.iota {dimensions = array<i32: 0>} : vector<256x1xi32>
      %c128_i32 = arith.constant 128 : i32
      %29 = arith.muli %arg0, %c128_i32 : i32
      %c128_i32_15 = arith.constant 128 : i32
      %30 = vector.broadcast %c128_i32_15 : i32 to vector<256x1xi32>
      %31 = arith.cmpi slt, %28, %30 : vector<256x1xi32>
      %c128_i32_16 = arith.constant 128 : i32
      %32 = vector.broadcast %c128_i32_16 : i32 to vector<256x1xi32>
      %33 = arith.subi %28, %32 : vector<256x1xi32>
      %34 = arith.select %31, %28, %33 : vector<256x1xi1>, vector<256x1xi32>
      %35 = vector.broadcast %29 : i32 to vector<256x1xi32>
      %36 = arith.addi %35, %34 : vector<256x1xi32>
      %c4_i32 = arith.constant 4 : i32
      %37 = vector.broadcast %c4_i32 : i32 to vector<256x1xi32>
      %38 = arith.cmpi slt, %36, %37 : vector<256x1xi32>
      %cst_17 = arith.constant 0.000000e+00 : f32
      %39 = vector.broadcast %cst_17 : f32 to vector<256x1xf32>
      %40 = arith.select %38, %27, %39 : vector<256x1xi1>, vector<256x1xf32>
      %41 = vector.shape_cast %40 : vector<256x1xf32> to vector<1x256x1xf32>
      %cst_18 = arith.constant dense<0.000000e+00> : vector<1xf32>
      %42 = vector.multi_reduction <add>, %41, %cst_18 [1, 2] : vector<1x256x1xf32> to vector<1xf32>
      %43 = vector.shape_cast %42 : vector<1xf32> to vector<1x1x1xf32>
      %44 = vector.extract %43[0, 0, 0] : f32 from vector<1x1x1xf32>
      %45 = vector.extract_strided_slice %3 {offsets = [0, 0], sizes = [128, 128], strides = [1, 1]} : vector<256x128xf32> to vector<128x128xf32>
      %46 = vector.extract_strided_slice %3 {offsets = [128, 0], sizes = [128, 128], strides = [1, 1]} : vector<256x128xf32> to vector<128x128xf32>
      %47 = arith.mulf %45, %46 : vector<128x128xf32>
      %cst_19 = arith.constant dense<0.000000e+00> : vector<128xf32>
      %48 = vector.multi_reduction <add>, %47, %cst_19 [1] : vector<128x128xf32> to vector<128xf32>
      %49 = vector.shape_cast %48 : vector<128xf32> to vector<128x1xf32>
      %50 = tpu.iota {dimensions = array<i32: 0>} : vector<128x1xi32>
      %c128_i32_20 = arith.constant 128 : i32
      %51 = arith.muli %arg0, %c128_i32_20 : i32
      %52 = vector.broadcast %51 : i32 to vector<128x1xi32>
      %53 = arith.addi %52, %50 : vector<128x1xi32>
      %c4_i32_21 = arith.constant 4 : i32
      %54 = vector.broadcast %c4_i32_21 : i32 to vector<128x1xi32>
      %55 = arith.cmpi slt, %53, %54 : vector<128x1xi32>
      %cst_22 = arith.constant 0.000000e+00 : f32
      %56 = vector.broadcast %cst_22 : f32 to vector<128x1xf32>
      %57 = arith.select %55, %49, %56 : vector<128x1xi1>, vector<128x1xf32>
      %58 = vector.shape_cast %57 : vector<128x1xf32> to vector<1x128x1xf32>
      %cst_23 = arith.constant dense<0.000000e+00> : vector<1xf32>
      %59 = vector.multi_reduction <add>, %58, %cst_23 [1, 2] : vector<1x128x1xf32> to vector<1xf32>
      %60 = vector.shape_cast %59 : vector<1xf32> to vector<1x1x1xf32>
      %61 = vector.extract %60[0, 0, 0] : f32 from vector<1x1x1xf32>
      %cst_24 = arith.constant 2.000000e+00 : f32
      %62 = arith.mulf %cst_24, %61 : f32
      %63 = arith.subf %44, %62 : f32
      %c0_25 = arith.constant 0 : index
      %c0_26 = arith.constant 0 : index
      %64 = memref.load %arg4[%c0_25, %c0_26] : memref<1x1xf32, #tpu.memory_space<smem>>
      memref.store %63, %arg4[%c0_25, %c0_26] : memref<1x1xf32, #tpu.memory_space<smem>>
    } else {
    }
    return
  }
  func.func @transform_0(%arg0: i32, %arg1: i32) -> (i32, i32) {
    %c0_i32 = arith.constant 0 : i32
    %c0_i32_0 = arith.constant 0 : i32
    return %arg0, %c0_i32 : i32, i32
  }
  func.func @transform_1(%arg0: i32, %arg1: i32) -> (i32, i32) {
    %c0_i32 = arith.constant 0 : i32
    %c0_i32_0 = arith.constant 0 : i32
    return %arg1, %c0_i32 : i32, i32
  }
  func.func @transform_2(%arg0: i32, %arg1: i32) -> (i32, i32) {
    %c0_i32 = arith.constant 0 : i32
    %c0_i32_0 = arith.constant 0 : i32
    return %arg0, %c0_i32 : i32, i32
  }
}

</mosaic_0001>

<bundles_post_ra>
// kernel: tpu_custom_call.1
= control target key start
LH: loop header
LB: loop body
LE: loop exit
PB: predicated region body
PF: predicated region fallthrough
CT: control target
= control target key end

     0   :  { %7 = vsyncpa [#allocation4], 0  ;;  %s2246_s0 = inlined_call_operand.hbm [shape: f32[256,128], index: 0, kind: input, shape index: {}]   ;;  %s2247_s1 = inlined_call_operand.hbm [shape: f32[256,128], index: 1, kind: input, shape index: {}]   ;;  %s2248_s2 = inlined_call_operand.hbm [shape: f32[1,1], index: 2, kind: output, shape index: {}]  }
   0x1   :  { %8 = vsyncpa [#allocation7], 0 }
   0x2   :  { %9 = vsyncpa [#allocation5], 0  ;;  %s2166_s9 = smov [#allocation3]   ;;  %s2106_s13 = scalar_lea.hbm %s2246_s0, 4096 }
   0x3   :  { %s15_s10 = sshll.u32 %s2166_s9, 4  ;;  %p2107_p0 = scmp.ne.s32.totalorder %s2246_s0, %s2106_s13  ;;  %s16_s10 = int_to_ptr.vmem [resolvable:$true] %s15_s10 }
   0x4   :  { %p2110_p1 = scmp.lt.u32.totalorder %s2106_s13, %s2246_s0 }
   0x6   :  { %p2112_p2 = pnand %p2110_p1, %p2107_p0 }
   0x8   :  { %2115 = shalt.err (!%p2112_p2)
}
   0x9   :  { %s2116_s18 = scalar_lea.vmem %s16_s10, 4096  ;;  %p2121_p4 = scmp.lt.s32.totalorder %s16_s10, %s16_s10 }
   0xa   :  { %p2117_p3 = scmp.ne.s32.totalorder %s16_s10, %s2116_s18  ;;  %p2122_p5 = scmp.lt.s32.totalorder %s2116_s18, %s2116_s18 }
   0xc   :  { %p2123_p6 = por %p2122_p5, %p2121_p4 }
   0xe   :  { %p2124_p7 = pnand %p2123_p6, %p2117_p3 }
  0x10   :  { %2127 = shalt.err (!%p2124_p7)
}
  0x11   :  { %s2167_s19 = smov 128   ;;  %s2168_s20 = smov 8  }
  0x12   :  { %21 = dma.hbm_to_vmem [thread:$0]  %s2246_s0, 4096, %s16_s10, [#allocation4], %s2167_s19, %s2167_s19, %s2168_s20  }
  0x13   :  { %s2169_s23 = smov [#allocation6]   ;;  %s2128_s27 = scalar_lea.hbm %s2247_s1, 4096 }
  0x14   :  { %s27_s24 = sshll.u32 %s2169_s23, 4  ;;  %p2129_p8 = scmp.ne.s32.totalorder %s2247_s1, %s2128_s27  ;;  %s28_s24 = int_to_ptr.vmem [resolvable:$true] %s27_s24 }
  0x15   :  { %p2132_p9 = scmp.lt.u32.totalorder %s2128_s27, %s2247_s1 }
  0x17   :  { %p2134_p10 = pnand %p2132_p9, %p2129_p8 }
  0x19   :  { %2137 = shalt.err (!%p2134_p10)
}
  0x1a   :  { %s2138_s4 = scalar_lea.vmem %s28_s24, 4096  ;;  %p2143_p12 = scmp.lt.s32.totalorder %s28_s24, %s28_s24 }
  0x1b   :  { %p2139_p11 = scmp.ne.s32.totalorder %s28_s24, %s2138_s4  ;;  %p2144_p13 = scmp.lt.s32.totalorder %s2138_s4, %s2138_s4 }
  0x1d   :  { %p2145_p0 = por %p2144_p13, %p2143_p12 }
  0x1f   :  { %p2146_p1 = pnand %p2145_p0, %p2139_p11 }
  0x21   :  { %2149 = shalt.err (!%p2146_p1)
}
  0x22   :  { %33 = dma.hbm_to_vmem [thread:$0]  %s2247_s1, 4096, %s28_s24, [#allocation7], %s2167_s19, %s2167_s19, %s2168_s20  }
  0x23   :  { %2160 = dma.done.wait [#allocation4], 4096  }
  0x24   :  { %2161 = vsyncadd [#allocation4], 4294963200 }
  0x25   :  { %2162 = dma.done.wait [#allocation7], 4096  }
  0x26   :  { %2163 = vsyncadd [#allocation7], 4294963200  ;;  %v124_v0 = vld [vmem:[#allocation6 + $0x80] sm:$0xff]  ;;  %v125_v1 = vld [vmem:[#allocation6 + $0x88] sm:$0xff]  ;;  %vm1617_vm6 = vcmask 7168   ;;  %s2150_s11 = scalar_lea.hbm %s2248_s2, 16 }
  0x27   :  { %v108_v2 = vld [vmem:[#allocation6] sm:$0xff]  ;;  %v2037_v3 = vpack.c.bf16 %v125_v1, %v124_v0  ;;  %v109_v4 = vld [vmem:[#allocation6 + $0x8] sm:$0xff]  ;;  %v126_v5 = vld [vmem:[#allocation6 + $0x90] sm:$0xff]  ;;  %p2151_p2 = scmp.ne.s32.totalorder %s2248_s2, %s2150_s11  ;;  %p2154_p3 = scmp.lt.u32.totalorder %s2150_s11, %s2248_s2 }
  0x28   :  { %v127_v6 = vld [vmem:[#allocation6 + $0x98] sm:$0xff]  ;;  %v2039_v7 = vpack.c.bf16 %v109_v4, %v108_v2  ;;  %v110_v9 = vld [vmem:[#allocation6 + $0x10] sm:$0xff]  ;;  %v128_v11 = vld [vmem:[#allocation6 + $0xa0] sm:$0xff] }
  0x29   :  { %v2041_v8 = vpack.c.bf16 %v127_v6, %v126_v5  ;;  %2038 = vmatprep.subr.bf16.mxu0 %v2037_v3  ;;  %2069 = vmatprep.subr.bf16.mxu1 %v2037_v3  ;;  %v111_v10 = vld [vmem:[#allocation6 + $0x18] sm:$0xff]  ;;  %v129_v12 = vld [vmem:[#allocation6 + $0xa8] sm:$0xff]  ;;  %v2210_v15 = vld [vmem:[#allocation3] sm:$0xff]  ;;  %p2156_p4 = pnand %p2154_p3, %p2151_p2 }
  0x2a   :  { %2040 = vmatpush3.bf16.xpose.msra.mxu0 %v2039_v7  ;;  %2077 = vmatpush3.bf16.xpose.msra.mxu1 %v2039_v7  ;;  %v2043_v13 = vpack.c.bf16 %v111_v10, %v110_v9  ;;  %v2045_v14 = vpack.c.bf16 %v129_v12, %v128_v11  ;;  %v2213_v16 = vld [vmem:[#allocation3 + $0x80] sm:$0xff]  ;;  %v113_v18 = vld [vmem:[#allocation6 + $0x28] sm:$0xff]  ;;  %v130_v19 = vld [vmem:[#allocation6 + $0xb0] sm:$0xff] }
  0x2b   :  { %2042 = vmatprep.subr.bf16.mxu0 %v2041_v8  ;;  %2070 = vmatprep.subr.bf16.mxu1 %v2041_v8  ;;  %v112_v17 = vld [vmem:[#allocation6 + $0x20] sm:$0xff]  ;;  %v131_v20 = vld [vmem:[#allocation6 + $0xb8] sm:$0xff]  ;;  %v114_v23 = vld [vmem:[#allocation6 + $0x30] sm:$0xff]  ;;  %v1690_v50 = vmul.f32 %v2213_v16, %v2210_v15 }
  0x2c   :  { %1973 = vmatprep.mubr.f32.mxu0 %v2210_v15  ;;  %2005 = vmatprep.mubr.f32.mxu1 %v2213_v16  ;;  %v2047_v21 = vpack.c.bf16 %v113_v18, %v112_v17  ;;  %v2049_v22 = vpack.c.bf16 %v131_v20, %v130_v19  ;;  %v115_v24 = vld [vmem:[#allocation6 + $0x38] sm:$0xff]  ;;  %v132_v25 = vld [vmem:[#allocation6 + $0xc0] sm:$0xff]  ;;  %v133_v26 = vld [vmem:[#allocation6 + $0xc8] sm:$0xff] }
  0x2d   :  { %v2051_v27 = vpack.c.bf16 %v115_v24, %v114_v23  ;;  %v2053_v28 = vpack.c.bf16 %v133_v26, %v132_v25  ;;  %v116_v29 = vld [vmem:[#allocation6 + $0x40] sm:$0xff]  ;;  %v117_v30 = vld [vmem:[#allocation6 + $0x48] sm:$0xff]  ;;  %v134_v31 = vld [vmem:[#allocation6 + $0xd0] sm:$0xff]  ;;  %1706 = vadd.xlane.f32.xlu1 %v1690_v50 }
  0x2e   :  { %v135_v32 = vld [vmem:[#allocation6 + $0xd8] sm:$0xff]  ;;  %v2055_v33 = vpack.c.bf16 %v117_v30, %v116_v29  ;;  %v118_v35 = vld [vmem:[#allocation6 + $0x50] sm:$0xff]  ;;  %v136_v37 = vld [vmem:[#allocation6 + $0xe0] sm:$0xff] }
  0x2f   :  { %v2057_v34 = vpack.c.bf16 %v135_v32, %v134_v31  ;;  %v119_v36 = vld [vmem:[#allocation6 + $0x58] sm:$0xff]  ;;  %v137_v38 = vld [vmem:[#allocation6 + $0xe8] sm:$0xff]  ;;  %v120_v41 = vld [vmem:[#allocation6 + $0x60] sm:$0xff] }
  0x30   :  { %v2059_v39 = vpack.c.bf16 %v119_v36, %v118_v35  ;;  %v2061_v40 = vpack.c.bf16 %v137_v38, %v136_v37  ;;  %v121_v42 = vld [vmem:[#allocation6 + $0x68] sm:$0xff]  ;;  %v138_v43 = vld [vmem:[#allocation6 + $0xf0] sm:$0xff]  ;;  %v139_v44 = vld [vmem:[#allocation6 + $0xf8] sm:$0xff] }
  0x31   :  { %v2063_v45 = vpack.c.bf16 %v121_v42, %v120_v41  ;;  %v2065_v46 = vpack.c.bf16 %v139_v44, %v138_v43  ;;  %v122_v47 = vld [vmem:[#allocation6 + $0x70] sm:$0xff]  ;;  %v123_v48 = vld [vmem:[#allocation6 + $0x78] sm:$0xff]  ;;  %v77_v51 = vld [vmem:[#allocation3 + $0x8] sm:$0xff] }
  0x32   :  { %2044 = vmatpush3.bf16.xpose.msra.mxu0 %v2043_v13  ;;  %2078 = vmatpush3.bf16.xpose.msra.mxu1 %v2043_v13  ;;  %v2067_v49 = vpack.c.bf16 %v123_v48, %v122_v47  ;;  %v93_v52 = vld [vmem:[#allocation3 + $0x88] sm:$0xff]  ;;  %v78_v53 = vld [vmem:[#allocation3 + $0x10] sm:$0xff]  ;;  %v79_v55 = vld [vmem:[#allocation3 + $0x18] sm:$0xff]  ;;  %v594_v13 = vlaneseq }
  0x33   :  { %2046 = vmatprep.subr.bf16.mxu0 %v2045_v14  ;;  %2071 = vmatprep.subr.bf16.mxu1 %v2045_v14  ;;  %v94_v54 = vld [vmem:[#allocation3 + $0x90] sm:$0xff]  ;;  %v95_v56 = vld [vmem:[#allocation3 + $0x98] sm:$0xff]  ;;  %v80_v57 = vld [vmem:[#allocation3 + $0x20] sm:$0xff] }
  0x34   :  { %v96_v58 = vld [vmem:[#allocation3 + $0xa0] sm:$0xff]  ;;  %v81_v59 = vld [vmem:[#allocation3 + $0x28] sm:$0xff]  ;;  %v82_v61 = vld [vmem:[#allocation3 + $0x30] sm:$0xff]  ;;  %v2220_v18 = vshrl.u32 %v594_v13, 7  ;;  %v628_v19 = vand.u32 127, %v594_v13 }
  0x35   :  { %v97_v60 = vld [vmem:[#allocation3 + $0xa8] sm:$0xff]  ;;  %v98_v62 = vld [vmem:[#allocation3 + $0xb0] sm:$0xff]  ;;  %v83_v63 = vld [vmem:[#allocation3 + $0x38] sm:$0xff] }
  0x36   :  { %v99_v0 = vld [vmem:[#allocation3 + $0xb8] sm:$0xff]  ;;  %v84_v1 = vld [vmem:[#allocation3 + $0x40] sm:$0xff]  ;;  %v85_v3 = vld [vmem:[#allocation3 + $0x48] sm:$0xff]  ;;  %v611_v20 = vadd.s32 128, %v2220_v18  ;;  %vm631_vm0 = vcmp.ne.s32.totalorder %v2220_v18, %v628_v19  ;;  %vm771_vm1 = vcmp.lt.s32.totalorder %v628_v19, 4  ;;  %vm1553_vm5 = vcmp.lt.s32.totalorder %v2220_v18, 4 }
  0x37   :  { %v100_v2 = vld [vmem:[#allocation3 + $0xc0] sm:$0xff]  ;;  %v101_v4 = vld [vmem:[#allocation3 + $0xc8] sm:$0xff]  ;;  %vm777_vm2 = vmand %vm631_vm0, %vm771_vm1 }
  0x38   :  { %v86_v32 = vld [vmem:[#allocation3 + $0x50] sm:$0xff]  ;;  %v103_v35 = vld [vmem:[#allocation3 + $0xd8] sm:$0xff]  ;;  %v88_v36 = vld [vmem:[#allocation3 + $0x60] sm:$0xff] }
  0x39   :  { %v104_v37 = vld [vmem:[#allocation3 + $0xe0] sm:$0xff]  ;;  %v89_v38 = vld [vmem:[#allocation3 + $0x68] sm:$0xff]  ;;  %v90_v41 = vld [vmem:[#allocation3 + $0x70] sm:$0xff] }
  0x3a   :  { %2048 = vmatpush3.bf16.xpose.msra.mxu0 %v2047_v21  ;;  %2079 = vmatpush3.bf16.xpose.msra.mxu1 %v2047_v21  ;;  %v629_v21 = vadd.s32 128, %v628_v19 }
  0x3b   :  { %2050 = vmatprep.subr.bf16.mxu0 %v2049_v22  ;;  %2072 = vmatprep.subr.bf16.mxu1 %v2049_v22 }
  0x3c   :  { %vm664_vm3 = vcmp.ne.s32.totalorder %v611_v20, %v629_v21 }
  0x3d   :  { %vm810_vm4 = vmand %vm664_vm3, %vm771_vm1 }
  0x42   :  { %2052 = vmatpush3.bf16.xpose.msra.mxu0 %v2051_v27  ;;  %2080 = vmatpush3.bf16.xpose.msra.mxu1 %v2051_v27 }
  0x43   :  { %2054 = vmatprep.subr.bf16.mxu0 %v2053_v28  ;;  %2073 = vmatprep.subr.bf16.mxu1 %v2053_v28 }
  0x4a   :  { %2056 = vmatpush3.bf16.xpose.msra.mxu0 %v2055_v33  ;;  %2081 = vmatpush3.bf16.xpose.msra.mxu1 %v2055_v33  ;;  %v102_v33 = vld [vmem:[#allocation3 + $0xd0] sm:$0xff] }
  0x4b   :  { %2058 = vmatprep.subr.bf16.mxu0 %v2057_v34  ;;  %2074 = vmatprep.subr.bf16.mxu1 %v2057_v34  ;;  %v87_v34 = vld [vmem:[#allocation3 + $0x58] sm:$0xff] }
  0x52   :  { %2060 = vmatpush3.bf16.xpose.msra.mxu0 %v2059_v39  ;;  %2082 = vmatpush3.bf16.xpose.msra.mxu1 %v2059_v39  ;;  %v105_v39 = vld [vmem:[#allocation3 + $0xe8] sm:$0xff] }
  0x53   :  { %2062 = vmatprep.subr.bf16.mxu0 %v2061_v40  ;;  %2075 = vmatprep.subr.bf16.mxu1 %v2061_v40  ;;  %v106_v40 = vld [vmem:[#allocation3 + $0xf0] sm:$0xff] }
  0x5a   :  { %2064 = vmatpush3.bf16.xpose.msra.mxu0 %v2063_v45  ;;  %2083 = vmatpush3.bf16.xpose.msra.mxu1 %v2063_v45  ;;  %v91_v45 = vld [vmem:[#allocation3 + $0x78] sm:$0xff] }
  0x5b   :  { %2066 = vmatprep.subr.bf16.mxu0 %v2065_v46  ;;  %2076 = vmatprep.subr.bf16.mxu1 %v2065_v46  ;;  %v107_v46 = vld [vmem:[#allocation3 + $0xf8] sm:$0xff] }
  0x62   :  { %2068 = vmatpush3.bf16.xpose.msra.mxu0 %v2067_v49  ;;  %2084 = vmatpush3.bf16.xpose.msra.mxu1 %v2067_v49 }
  0x69   :  { %1974 = vmatmul.mubr.f32.vlgmr.msra.gmra.mrb[0].mxu0 %v2210_v15  ;;  %2006 = vmatmul.mubr.f32.vlgmr.msra.gmra.mrb[0].mxu1 %v2213_v16 }
  0x6a   :  { %1975 = vmatprep.mubr.f32.mxu0 %v77_v51  ;;  %2007 = vmatprep.mubr.f32.mxu1 %v93_v52 }
  0x6d   :  { %1976 = vmatmul.mubr.f32.gmra.mrb[2].mxu0 %v77_v51  ;;  %2008 = vmatmul.mubr.f32.gmra.mrb[2].mxu1 %v93_v52 }
  0x6e   :  { %1977 = vmatprep.mubr.f32.mxu0 %v78_v53  ;;  %2009 = vmatprep.mubr.f32.mxu1 %v94_v54 }
  0x71   :  { %1978 = vmatmul.mubr.f32.gmra.mrb[4].mxu0 %v78_v53  ;;  %2010 = vmatmul.mubr.f32.gmra.mrb[4].mxu1 %v94_v54 }
  0x72   :  { %1979 = vmatprep.mubr.f32.mxu0 %v79_v55  ;;  %2011 = vmatprep.mubr.f32.mxu1 %v95_v56 }
  0x75   :  { %1980 = vmatmul.mubr.f32.gmra.mrb[6].mxu0 %v79_v55  ;;  %2012 = vmatmul.mubr.f32.gmra.mrb[6].mxu1 %v95_v56 }
  0x76   :  { %1981 = vmatprep.mubr.f32.mxu0 %v80_v57  ;;  %2013 = vmatprep.mubr.f32.mxu1 %v96_v58 }
  0x79   :  { %1982 = vmatmul.mubr.f32.gmra.mrb[8].mxu0 %v80_v57  ;;  %2014 = vmatmul.mubr.f32.gmra.mrb[8].mxu1 %v96_v58 }
  0x7a   :  { %1983 = vmatprep.mubr.f32.mxu0 %v81_v59  ;;  %2015 = vmatprep.mubr.f32.mxu1 %v97_v60 }
  0x7d   :  { %1984 = vmatmul.mubr.f32.gmra.mrb[10].mxu0 %v81_v59  ;;  %2016 = vmatmul.mubr.f32.gmra.mrb[10].mxu1 %v97_v60 }
  0x7e   :  { %1985 = vmatprep.mubr.f32.mxu0 %v82_v61  ;;  %2017 = vmatprep.mubr.f32.mxu1 %v98_v62 }
  0x81   :  { %1986 = vmatmul.mubr.f32.gmra.mrb[12].mxu0 %v82_v61  ;;  %2018 = vmatmul.mubr.f32.gmra.mrb[12].mxu1 %v98_v62 }
  0x82   :  { %1987 = vmatprep.mubr.f32.mxu0 %v83_v63  ;;  %2019 = vmatprep.mubr.f32.mxu1 %v99_v0 }
  0x85   :  { %1988 = vmatmul.mubr.f32.gmra.mrb[14].mxu0 %v83_v63  ;;  %2020 = vmatmul.mubr.f32.gmra.mrb[14].mxu1 %v99_v0 }
  0x86   :  { %1989 = vmatprep.mubr.f32.mxu0 %v84_v1  ;;  %2021 = vmatprep.mubr.f32.mxu1 %v100_v2 }
  0x89   :  { %1990 = vmatmul.mubr.f32.gmra.mrb[16].mxu0 %v84_v1  ;;  %2022 = vmatmul.mubr.f32.gmra.mrb[16].mxu1 %v100_v2 }
  0x8a   :  { %1991 = vmatprep.mubr.f32.mxu0 %v85_v3  ;;  %2023 = vmatprep.mubr.f32.mxu1 %v101_v4 }
  0x8d   :  { %1992 = vmatmul.mubr.f32.gmra.mrb[18].mxu0 %v85_v3  ;;  %2024 = vmatmul.mubr.f32.gmra.mrb[18].mxu1 %v101_v4 }
  0x8e   :  { %1993 = vmatprep.mubr.f32.mxu0 %v86_v32  ;;  %2025 = vmatprep.mubr.f32.mxu1 %v102_v33 }
  0x91   :  { %1994 = vmatmul.mubr.f32.gmra.mrb[20].mxu0 %v86_v32  ;;  %2026 = vmatmul.mubr.f32.gmra.mrb[20].mxu1 %v102_v33 }
  0x92   :  { %1995 = vmatprep.mubr.f32.mxu0 %v87_v34  ;;  %2027 = vmatprep.mubr.f32.mxu1 %v103_v35 }
  0x95   :  { %1996 = vmatmul.mubr.f32.gmra.mrb[22].mxu0 %v87_v34  ;;  %2028 = vmatmul.mubr.f32.gmra.mrb[22].mxu1 %v103_v35 }
  0x96   :  { %1997 = vmatprep.mubr.f32.mxu0 %v88_v36  ;;  %2029 = vmatprep.mubr.f32.mxu1 %v104_v37 }
  0x99   :  { %1998 = vmatmul.mubr.f32.gmra.mrb[24].mxu0 %v88_v36  ;;  %2030 = vmatmul.mubr.f32.gmra.mrb[24].mxu1 %v104_v37 }
  0x9a   :  { %1999 = vmatprep.mubr.f32.mxu0 %v89_v38  ;;  %2031 = vmatprep.mubr.f32.mxu1 %v105_v39 }
  0x9d   :  { %2000 = vmatmul.mubr.f32.gmra.mrb[26].mxu0 %v89_v38  ;;  %2032 = vmatmul.mubr.f32.gmra.mrb[26].mxu1 %v105_v39 }
  0x9e   :  { %2033 = vmatprep.mubr.f32.mxu1 %v106_v40  ;;  %2001 = vmatprep.mubr.f32.mxu0 %v90_v41 }
  0xa1   :  { %2002 = vmatmul.mubr.f32.gmra.mrb[28].mxu0 %v90_v41  ;;  %2034 = vmatmul.mubr.f32.gmra.mrb[28].mxu1 %v106_v40 }
  0xa2   :  { %2003 = vmatprep.mubr.f32.mxu0 %v91_v45  ;;  %2035 = vmatprep.mubr.f32.mxu1 %v107_v46 }
  0xa5   :  { %2004 = vmatmul.mubr.f32.gmra.mrb[30].mxu0 %v91_v45  ;;  %2036 = vmatmul.mubr.f32.gmra.mrb[30].mxu1 %v107_v46 }
  0xba   :  { %v1707_v42 = vpop.xlane.xlu1 %1706 }
  0xbb   :  { %v1770_v43 = vsel %vm1553_vm5, %v1707_v42, 0.0 }
  0xbc   :  { %v1786_v44 = vsel %vm1617_vm6, %v1770_v43, 0.0 }
 0x13c   :  { %v206_v5 = vpop.f32.mrb[0].mxu0  ;;  %v302_v6 = vpop.f32.mrb[0].mxu1 }
 0x13d   :  { %v1845_v7 = vadd.f32 -2.0, %v206_v5  ;;  %v208_v8 = vpop.f32.mrb[1].mxu0  ;;  %v1877_v9 = vadd.f32 -2.0, %v302_v6  ;;  %v304_v10 = vpop.f32.mrb[1].mxu1 }
 0x13e   :  { %v1846_v11 = vadd.f32 -2.0, %v208_v8  ;;  %v1878_v12 = vadd.f32 -2.0, %v304_v10 }
 0x13f   :  { %v461_v14 = vmul.f32 1.442695, %v1845_v7  ;;  %v525_v15 = vmul.f32 1.442695, %v1877_v9 }
 0x140   :  { %v463_v16 = vmul.f32 1.442695, %v1846_v11  ;;  %v527_v17 = vmul.f32 1.442695, %v1878_v12  ;;  %v212_v47 = vpop.f32.mrb[2].mxu0  ;;  %v308_v48 = vpop.f32.mrb[2].mxu1 }
 0x141   :  { %2094 = vpow2.f32 %v461_v14  ;;  %v214_v49 = vpop.f32.mrb[3].mxu0  ;;  %v310_v50 = vpop.f32.mrb[3].mxu1 }
 0x142   :  { %2096 = vpow2.f32 %v463_v16 }
 0x143   :  { %2098 = vpow2.f32 %v525_v15 }
 0x144   :  { %2100 = vpow2.f32 %v527_v17  ;;  %v218_v51 = vpop.f32.mrb[4].mxu0  ;;  %v314_v52 = vpop.f32.mrb[4].mxu1 }
 0x145   :  { %v220_v53 = vpop.f32.mrb[5].mxu0  ;;  %v316_v54 = vpop.f32.mrb[5].mxu1 }
 0x148   :  { %v224_v55 = vpop.f32.mrb[6].mxu0  ;;  %v320_v56 = vpop.f32.mrb[6].mxu1 }
 0x149   :  { %v226_v57 = vpop.f32.mrb[7].mxu0  ;;  %v322_v58 = vpop.f32.mrb[7].mxu1 }
 0x14b   :  { %v2095_v22 = vpop.eup %2094 }
 0x14c   :  { %v2097_v23 = vpop.eup %2096  ;;  %v873_v24 = vsel %vm777_vm2, %v2095_v22, 0.0  ;;  %v230_v59 = vpop.f32.mrb[8].mxu0 }
 0x14d   :  { %v2099_v25 = vpop.eup %2098  ;;  %v874_v26 = vsel %vm771_vm1, %v2097_v23, 0.0  ;;  %v326_v60 = vpop.f32.mrb[8].mxu1 }
 0x14e   :  { %v2101_v27 = vpop.eup %2100  ;;  %v937_v28 = vadd.f32 %v874_v26, %v873_v24  ;;  %v905_v29 = vsel %vm771_vm1, %v2099_v25, 0.0  ;;  %v232_v61 = vpop.f32.mrb[9].mxu0 }
 0x14f   :  { %v906_v30 = vsel %vm810_vm4, %v2101_v27, 0.0  ;;  %v328_v62 = vpop.f32.mrb[9].mxu1 }
 0x150   :  { %1199 = vadd.xlane.f32.xlu0 %v937_v28  ;;  %v953_v31 = vadd.f32 %v906_v30, %v905_v29  ;;  %v236_v63 = vpop.f32.mrb[10].mxu0  ;;  %v332_v0 = vpop.f32.mrb[10].mxu1 }
 0x151   :  { %v238_v1 = vpop.f32.mrb[11].mxu0  ;;  %v334_v2 = vpop.f32.mrb[11].mxu1 }
 0x154   :  { %1231 = vadd.xlane.f32.xlu0 %v953_v31  ;;  %v242_v3 = vpop.f32.mrb[12].mxu0  ;;  %v338_v4 = vpop.f32.mrb[12].mxu1 }
 0x155   :  { %v244_v5 = vpop.f32.mrb[13].mxu0  ;;  %v340_v6 = vpop.f32.mrb[13].mxu1 }
 0x158   :  { %1817 = vadd.xlane.f32.xlu0 %v1786_v44  ;;  %v248_v7 = vpop.f32.mrb[14].mxu0  ;;  %v344_v8 = vpop.f32.mrb[14].mxu1 }
 0x159   :  { %v250_v9 = vpop.f32.mrb[15].mxu0  ;;  %v346_v10 = vpop.f32.mrb[15].mxu1 }
 0x15c   :  { %v254_v11 = vpop.f32.mrb[16].mxu0  ;;  %v350_v12 = vpop.f32.mrb[16].mxu1 }
 0x15d   :  { %v256_v13 = vpop.f32.mrb[17].mxu0  ;;  %v352_v14 = vpop.f32.mrb[17].mxu1 }
 0x160   :  { %v260_v15 = vpop.f32.mrb[18].mxu0  ;;  %v356_v16 = vpop.f32.mrb[18].mxu1 }
 0x161   :  { %v262_v17 = vpop.f32.mrb[19].mxu0  ;;  %v358_v19 = vpop.f32.mrb[19].mxu1 }
 0x164   :  { %v266_v35 = vpop.f32.mrb[20].mxu0  ;;  %v362_v36 = vpop.f32.mrb[20].mxu1 }
 0x165   :  { %v268_v37 = vpop.f32.mrb[21].mxu0  ;;  %v364_v38 = vpop.f32.mrb[21].mxu1 }
 0x168   :  { %v272_v39 = vpop.f32.mrb[22].mxu0  ;;  %v368_v40 = vpop.f32.mrb[22].mxu1 }
 0x169   :  { %v274_v41 = vpop.f32.mrb[23].mxu0  ;;  %v370_v42 = vpop.f32.mrb[23].mxu1 }
 0x16c   :  { %v278_v43 = vpop.f32.mrb[24].mxu0  ;;  %v374_v44 = vpop.f32.mrb[24].mxu1 }
 0x16d   :  { %v280_v45 = vpop.f32.mrb[25].mxu0  ;;  %v376_v46 = vpop.f32.mrb[25].mxu1 }
 0x170   :  { %v284_v18 = vpop.f32.mrb[26].mxu0  ;;  %v380_v47 = vpop.f32.mrb[26].mxu1 }
 0x171   :  { %v286_v48 = vpop.f32.mrb[27].mxu0  ;;  %v382_v49 = vpop.f32.mrb[27].mxu1 }
 0x174   :  { %v290_v50 = vpop.f32.mrb[28].mxu0  ;;  %v386_v51 = vpop.f32.mrb[28].mxu1 }
 0x175   :  { %v292_v52 = vpop.f32.mrb[29].mxu0  ;;  %v388_v53 = vpop.f32.mrb[29].mxu1 }
 0x178   :  { %v296_v54 = vpop.f32.mrb[30].mxu0  ;;  %v392_v55 = vpop.f32.mrb[30].mxu1 }
 0x179   :  { %v298_v56 = vpop.f32.mrb[31].mxu0  ;;  %v394_v57 = vpop.f32.mrb[31].mxu1 }
 0x1dd   :  { %v1200_v20 = vpop.xlane.xlu0 %1199 }
 0x1de   :  { %v1263_v21 = vmax.f32 %v1200_v20, 1e-37 }
 0x1e0   :  { %2102 = vlog2.f32 %v1263_v21 }
 0x1e1   :  { %v1232_v22 = vpop.xlane.xlu0 %1231 }
 0x1e2   :  { %v1279_v23 = vmax.f32 %v1232_v22, 1e-37 }
 0x1e4   :  { %2104 = vlog2.f32 %v1279_v23 }
 0x1e5   :  { %v1818_v58 = vpop.xlane.xlu0 %1817 }
 0x1e6   :  { %v1819_v59 = vrot.slane %v1818_v58, 4 }
 0x1e8   :  { %v1820_v60 = vadd.f32 %v1819_v59, %v1818_v58 }
 0x1ea   :  { %v2103_v24 = vpop.eup %2102  ;;  %v1821_v61 = vrot.slane %v1820_v60, 2 }
 0x1eb   :  { %v1296_v25 = vmul.f32 0.6931472, %v2103_v24 }
 0x1ec   :  { %v1822_v1 = vadd.f32 %v1821_v61, %v1820_v60 }
 0x1ed   :  { %v1359_v26 = vadd.f32 2.0, %v1296_v25 }
 0x1ee   :  { %v2105_v27 = vpop.eup %2104  ;;  %v1823_v4 = vrot.slane %v1822_v1, 1 }
 0x1ef   :  { %v1328_v28 = vmul.f32 0.6931472, %v2105_v27  ;;  %v1585_v30 = vsel %vm1553_vm5, %v1359_v26, 0.0 }
 0x1f0   :  { %v1618_v32 = vsel %vm1617_vm6, %v1585_v30, 0.0  ;;  %v1824_v7 = vadd.f32 %v1823_v4, %v1822_v1 }
 0x1f1   :  { %v1375_v29 = vadd.f32 2.0, %v1328_v28 }
 0x1f3   :  { %v1601_v31 = vsel %vm1553_vm5, %v1375_v29, 0.0 }
 0x1f4   :  { %v1649_v33 = vsel %vm1617_vm6, %v1601_v31, 0.0 }
 0x1f5   :  { %v1650_v34 = vadd.f32 %v1649_v33, %v1618_v32 }
 0x1f7   :  { %1681 = vadd.xlane.f32.xlu1 %v1650_v34 }
 0x284   :  { %v1682_v62 = vpop.xlane.xlu1 %1681 }
 0x285   :  { %v1683_v63 = vrot.slane %v1682_v62, 4 }
 0x287   :  { %v1684_v0 = vadd.f32 %v1683_v63, %v1682_v62 }
 0x289   :  { %v1685_v2 = vrot.slane %v1684_v0, 2 }
 0x28b   :  { %v1686_v3 = vadd.f32 %v1685_v2, %v1684_v0 }
 0x28d   :  { %v1687_v5 = vrot.slane %v1686_v3, 1 }
 0x28f   :  { %v1688_v6 = vadd.f32 %v1687_v5, %v1686_v3 }
 0x291   :  { %2085 = vpush %v1688_v6 }
 0x292   :  { %2087 = vpush %v1824_v7 }
 0x2c2   :  { %s2086_s1 = spop %2085 }
 0x2c3   :  { %s2088_s6 = spop %2087 }
 0x2c4   :  { %s1826_s7 = smul.f32 2.0, %s2088_s6 }
 0x2c6   :  { %s1827_s8 = ssub.f32 %s2086_s1, %s1826_s7 }
 0x2c8   :  { %1829 = sst [smem:[#allocation8]] %s1827_s8 }
 0x2c9   :  { %2159 = shalt.err (!%p2156_p4)
}
 0x2ca   :  { %s2170_s16 = smov [#allocation8]  }
 0x2cb   :  { %1837 = dma.smem_to_hbm %s2170_s16, 16, %s2248_s2, [#allocation5]  }
 0x2cc   :  { %2164 = dma.done.wait [#allocation5], 16  }
 0x2cd   :  { %2165 = vsyncadd [#allocation5], 4294967280 }
 0x2ce   :  { %1841 = sfence }
 0x2cf   :  { %1842 = vsyncpa [#allocation4], 1 }
 0x2d0   :  { %1843 = vsyncpa [#allocation7], 1 }
 0x2d1   :  { %1844 = vsyncpa [#allocation5], 1 }

</bundles_post_ra>
